<compile_context>
chip_gen: v6e
topology: v6e:2x2x1
jax: 0.10.0
libtpu: 0.0.40
codegen_flags: <defaults>
</compile_context>

<pallas_src>
import functools

import jax
import jax.numpy as jnp
from jax.experimental import pallas as pl
from jax.experimental.pallas import tpu as pltpu


def _round_up(x, m):
    return (x + m - 1) // m * m


def _cdiv(a, b):
    return (a + b - 1) // b


# ---------------------------------------------------------------------------
# Kernel 1: global average pool (per-image channel means), row-tiled accumulator.
# ---------------------------------------------------------------------------
def _gap_kernel(x_ref, o_ref, *, inv_hw):
    """x_ref: (1, THg, Wp, Cin) bf16 tile of the zero-padded input.
    o_ref: (1, 1, Cin) f32 accumulator (zero padding does not change the sums)."""
    @pl.when(pl.program_id(1) == 0)
    def _():
        o_ref[...] = jnp.zeros_like(o_ref)

    x = x_ref[...].astype(jnp.float32)                       # (1, THg, Wp, Cin)
    part = jnp.sum(x, axis=(1, 2), keepdims=True)            # (1, 1, 1, Cin)
    o_ref[...] += part[:, 0] * inv_hw                        # (1, 1, Cin)


# ---------------------------------------------------------------------------
# Kernel 2: dilated / 1x1 branches + fused final 1x1 projection, one (batch, H-tile)
# grid step with a double-buffered halo-slab DMA.
# ---------------------------------------------------------------------------
def _aspp_kernel(c0_ref, x_hbm, w3_ref, w1_ref, wproj_ref, bias_ref, pbias_ref,
                 o_ref, xbuf, sem, *, TH, W_pad, Cin, Cout, rates, R):
    """
    c0_ref : (1, 1, Cout) f32 pooled-branch contribution (already projected), per image.
    x_hbm  : (N, Hgap, Wp, Cin) bf16, zero padded, resident in HBM (pl.ANY).
    xbuf   : (2, TH+2R, Wp, Cin) bf16 double-buffered halo slab.
    w*     : bf16 weights with the BN scale folded into the Cout columns.
    """
    n = pl.program_id(0)
    t = pl.program_id(1)
    n_t = pl.num_programs(1)
    nr = len(rates)
    rows = TH + 2 * R
    P = TH * W_pad
    slot = t % 2

    def slab_copy(tile_idx, slot_idx):
        return pltpu.make_async_copy(
            x_hbm.at[n, pl.ds(tile_idx * TH, rows)],
            xbuf.at[slot_idx],
            sem.at[slot_idx])

    # Prime the pipeline at the first tile of each image, then always prefetch the
    # next tile's slab so the DMA overlaps this tile's matmul chain (double buffer).
    @pl.when(t == 0)
    def _():
        slab_copy(0, 0).start()

    @pl.when(t + 1 < n_t)
    def _():
        slab_copy(t + 1, (t + 1) % 2).start()

    slab_copy(t, slot).wait()
    xcur = xbuf.at[slot]                                   # (rows, Wp, Cin) view

    def tap(dy, dx):
        # dy is an outer-dim (free) slice; dx is a sublane slice of width W_pad
        # (multiple of 8) so the (TH, W_pad, Cin) -> (TH*W_pad, Cin) merge is clean.
        return xcur[dy:dy + TH, dx:dx + W_pad, :].reshape(P, Cin)

    # --- 1x1 branch: conv -> bias -> ReLU -> fused projection -------------------
    br = jnp.dot(tap(R, R), w1_ref[...], preferred_element_type=jnp.float32)
    br = jnp.maximum(br + bias_ref[nr:nr + 1, :], 0.0)
    out = jnp.dot(br.astype(jnp.bfloat16),
                  wproj_ref[nr * Cout:(nr + 1) * Cout, :],
                  preferred_element_type=jnp.float32)

    # --- dilated 3x3 branches: 9 shifted matmuls each, bias + ReLU, immediately
    #     projected through the matching wproj block (fused concat-conv) ----------
    # TODO(synk): on v5e check whether the 27 f32 partial-sum adds saturate the
    #             single vst slot; if so, accumulate in a VMEM scratch instead.
    for ri, rate in enumerate(rates):
        acc = jnp.zeros((P, Cout), jnp.float32)
        for ky in range(3):
            dy = R + (ky - 1) * rate
            for kx in range(3):
                dx = R + (kx - 1) * rate
                acc = acc + jnp.dot(tap(dy, dx),
                                    w3_ref[ri * 9 + ky * 3 + kx],
                                    preferred_element_type=jnp.float32)
        br = jnp.maximum(acc + bias_ref[ri:ri + 1, :], 0.0)
        out = out + jnp.dot(br.astype(jnp.bfloat16),
                            wproj_ref[ri * Cout:(ri + 1) * Cout, :],
                            preferred_element_type=jnp.float32)

    # --- pooled-branch contribution (per image) + final BN bias + ReLU, f32, then
    #     a single bf16 lane/sublane-dense store ---------------------------------
    out = jnp.maximum(out + c0_ref[0] + pbias_ref[...], 0.0)
    o_ref[...] = out.reshape(1, TH, W_pad, Cout).astype(o_ref.dtype)


# ---------------------------------------------------------------------------
# Host-side helpers.
# ---------------------------------------------------------------------------
def _vmem_limit_bytes():
    """Generation-aware scoped-VMEM budget (conservative fraction of capacity)."""
    cap = 128 * 1024 * 1024
    try:
        info = pltpu.get_tpu_info()
        cap = int(getattr(info, "vmem_capacity_bytes", cap) or cap)
    except Exception:
        pass
    frac = 0.65 if cap <= 64 * 1024 * 1024 else 0.75   # v7x vs v5e/v6e
    return int(cap * frac)


def _pick_tile_h(H, W_pad, Wp, Cinp, Coutp, R, weight_bytes, budget_bytes):
    """Largest tile height whose full VMEM footprint fits the budget.
    No divisibility constraint: TH is an outer (non-layout) dim and the grid uses
    cdiv(H, TH) with a zero-padded ragged last tile."""
    def footprint(th):
        slab = 2 * (th + 2 * R) * Wp * Cinp * 2        # double-buffered halo slab (bf16)
        outb = 2 * th * W_pad * Coutp * 2              # double-buffered output block (bf16)
        f32tmp = 4 * th * W_pad * Coutp * 4            # out/acc/br f32 temporaries
        taps = 2 * th * W_pad * Cinp * 2               # transient tap-slice copies
        return weight_bytes + slab + outb + f32tmp + taps + (2 << 20)

    for th in range(H, 0, -1):
        if footprint(th) <= budget_bytes:
            return th
    return 1


def _prepare_params(params, Cin, Cout, Cinp, Coutp, nr):
    """Fold BN scales into the conv weights, pad channels to lane multiples, cast bf16.
    The pooled branch is kept unpadded/f32 (it is computed once per image host-side)."""
    scales, biases = params["scales"], params["biases"]      # (nr+2, Cout)
    pscale, pbias = params["pscale"], params["pbias"]        # (1, Cout)

    wpool_s = params["wpool"] * scales[0][None, :]                            # (Cin, Cout)
    bias0 = biases[0][None, :]                                                # (1, Cout)
    wproj = params["wproj"] * pscale                                          # ((nr+2)*Cout, Cout)
    wproj0_s = wproj[:Cout]                                                   # pooled block

    w1 = params["w1"] * scales[nr + 1][None, :]
    w3 = params["w3"] * jnp.repeat(scales[1:nr + 1], 9, axis=0)[:, None, :]   # per-rate scale

    dci, dco = Cinp - Cin, Coutp - Cout
    w1 = jnp.pad(w1, ((0, dci), (0, dco))).astype(jnp.bfloat16)
    w3 = jnp.pad(w3, ((0, 0), (0, dci), (0, dco))).astype(jnp.bfloat16)
    wproj_k = jnp.pad(wproj[Cout:].reshape(nr + 1, Cout, Cout),
                      ((0, 0), (0, dco), (0, dco)))
    wproj_k = wproj_k.reshape((nr + 1) * Coutp, Coutp).astype(jnp.bfloat16)
    biases_k = jnp.pad(biases[1:], ((0, 0), (0, dco))).astype(jnp.float32)
    pbias_p = jnp.pad(pbias, ((0, 0), (0, dco))).astype(jnp.float32)

    return dict(w3=w3, w1=w1, wproj_k=wproj_k, biases_k=biases_k, pbias=pbias_p,
                wpool_s=wpool_s, bias0=bias0, wproj0_s=wproj0_s)


def aspp_pallas(x_nchw, params, rates=(6, 12, 18), tile_h=None):
    """ASPP forward. x_nchw: (N, Cin, H, W) float32 -> (N, Cout, H, W) float32."""
    N, Cin, H, W = x_nchw.shape
    rates = tuple(rates)
    nr = len(rates)
    R = max(rates)
    Cout = params["wpool"].shape[1]

    LANE = 128
    Cinp = _round_up(Cin, LANE)                 # lane-dense input loads
    Coutp = _round_up(Cout, LANE)               # lane-dense (unmasked) output stores
    W_pad = _round_up(W, 8)                     # aligned matmul columns / output store
    Wp = _round_up(W_pad + 2 * R, 8)            # slab width (halo + aligned columns)

    prep = _prepare_params(params, Cin, Cout, Cinp, Coutp, nr)
    weight_bytes = (prep["w3"].size + prep["w1"].size + prep["wproj_k"].size) * 2 \
        + (prep["biases_k"].size + prep["pbias"].size) * 4

    vmem_limit = _vmem_limit_bytes()
    if tile_h is None:
        TH = _pick_tile_h(H, W_pad, Wp, Cinp, Coutp, R, weight_bytes,
                          int(vmem_limit * 0.9))
    else:
        TH = max(1, min(int(tile_h), H))
    n_t = _cdiv(H, TH)
    Hh = n_t * TH                               # padded output rows (sliced at the end)
    THg = 8                                     # GAP-kernel row tile (streaming, mem-bound)
    Hgap = _round_up(Hh + 2 * R, THg)           # padded slab rows (covers every halo DMA)

    # NCHW -> NHWC, pad channels to the lane width, zero pad spatially ONCE: the same
    # padded copy feeds the GAP kernel and the per-tile halo DMAs (no second input copy).
    x = jnp.transpose(x_nchw, (0, 2, 3, 1)).astype(jnp.bfloat16)
    xpad = jnp.pad(x, ((0, 0), (R, Hgap - H - R), (R, Wp - W - R), (0, Cinp - Cin)))

    # --- kernel 1: per-image global average pool (row-tiled accumulator grid) ------
    gap = pl.pallas_call(
        functools.partial(_gap_kernel, inv_hw=1.0 / float(H * W)),
        out_shape=jax.ShapeDtypeStruct((N, 1, Cinp), jnp.float32),
        grid_spec=pltpu.PrefetchScalarGridSpec(
            num_scalar_prefetch=0,
            grid=(N, Hgap // THg),
            in_specs=[pl.BlockSpec((1, THg, Wp, Cinp), lambda n, t: (n, t, 0, 0))],
            out_specs=pl.BlockSpec((1, 1, Cinp), lambda n, t: (n, 0, 0)),
        ),
        compiler_params=pltpu.CompilerParams(
            dimension_semantics=("parallel", "arbitrary"),
            vmem_limit_bytes=vmem_limit),
    )(xpad)

    # --- pooled branch, hoisted out of the per-tile kernel (once per image) --------
    # ImagePooling: pool -> 1x1 conv -> broadcast -> BN (no ReLU), then its slice of
    # the final 1x1 projection. Two tiny M=N matmuls, done in f32 on the host graph.
    b0 = gap[:, 0, :Cin] @ prep["wpool_s"] + prep["bias0"]            # (N, Cout)
    c0 = b0 @ prep["wproj0_s"]                                        # (N, Cout)
    c0 = jnp.pad(c0, ((0, 0), (0, Coutp - Cout))).astype(jnp.float32)[:, None, :]

    # --- kernel 2: ASPP branches + fused projection ---------------------------------
    kernel = functools.partial(_aspp_kernel, TH=TH, W_pad=W_pad, Cin=Cinp,
                               Cout=Coutp, rates=rates, R=R)

    def _build_call(single_buffer_weights):
        def wspec(shape):
            kwargs = {}
            if single_buffer_weights:
                # Constant index_map -> fetched once; single buffer halves the
                # resident weight footprint (critical at Cin=2048 / v7x VMEM).
                kwargs["pipeline_mode"] = pl.Buffered(1)
            return pl.BlockSpec(shape, lambda *_: (0,) * len(shape), **kwargs)

        return pl.pallas_call(
            kernel,
            out_shape=jax.ShapeDtypeStruct((N, Hh, W_pad, Coutp), jnp.bfloat16),
            grid_spec=pltpu.PrefetchScalarGridSpec(
                num_scalar_prefetch=0,
                grid=(N, n_t),
                in_specs=[
                    pl.BlockSpec((1, 1, Coutp), lambda n, t: (n, 0, 0)),   # c0 (per image)
                    pl.BlockSpec(memory_space=pl.ANY),                      # xpad (HBM)
                    wspec((nr * 9, Cinp, Coutp)),                           # w3
                    wspec((Cinp, Coutp)),                                   # w1
                    wspec(((nr + 1) * Coutp, Coutp)),                       # wproj (rates+1x1)
                    wspec((nr + 1, Coutp)),                                 # biases
                    wspec((1, Coutp)),                                      # pbias
                ],
                out_specs=pl.BlockSpec((1, TH, W_pad, Coutp),
                                       lambda n, t: (n, t, 0, 0)),
                scratch_shapes=[
                    pltpu.VMEM((2, TH + 2 * R, Wp, Cinp), jnp.bfloat16),    # 2x halo slab
                    pltpu.SemaphoreType.DMA((2,)),
                ],
            ),
            compiler_params=pltpu.CompilerParams(
                # The H-tile axis must stay sequential per image for the manual
                # double-buffered slab prefetch; the batch axis is megacore-parallel.
                dimension_semantics=("parallel", "arbitrary"),
                vmem_limit_bytes=vmem_limit),
        )

    args = (c0, xpad, prep["w3"], prep["w1"], prep["wproj_k"],
            prep["biases_k"], prep["pbias"])
    try:
        out_nhwc = _build_call(True)(*args)
    except Exception:
        # Fallback for JAX builds that reject single-buffered (Buffered(1)) blocks.
        out_nhwc = _build_call(False)(*args)

    # Drop the row/column/channel padding, cast back to f32, NHWC -> NCHW.
    out = out_nhwc[:, :H, :W, :Cout].astype(jnp.float32)
    return jnp.transpose(out, (0, 3, 1, 2))


def make_params(key, Cin, Cout, rates, eps=1e-5):
    """Deterministic synthetic parameters (PyTorch layout), BN folded to scale/bias."""
    rates = tuple(rates)
    nr = len(rates)
    n_convs = nr + 3          # wpool, nr x 3x3, w1, wproj
    n_bns = nr + 3            # pool BN, nr rate BNs, 1x1 BN, final BN
    keys = iter(jax.random.split(key, n_convs + 4 * n_bns))

    def conv_w(cout, cin, kh, kw):
        return 0.1 * jax.random.normal(next(keys), (cout, cin, kh, kw), jnp.float32)

    def folded_bn(c):
        gamma = 1.0 + 0.1 * jax.random.normal(next(keys), (c,), jnp.float32)
        beta = 0.1 * jax.random.normal(next(keys), (c,), jnp.float32)
        mean = 0.1 * jax.random.normal(next(keys), (c,), jnp.float32)
        var = 0.5 + jnp.abs(jax.random.normal(next(keys), (c,), jnp.float32))
        scale = gamma / jnp.sqrt(var + eps)
        bias = beta - mean * scale
        return scale, bias

    scales, biases = [], []

    # branch 0: ImagePooling (1x1 conv, no bias) + BN (no ReLU)
    wpool = conv_w(Cout, Cin, 1, 1)[:, :, 0, 0].T                    # (Cin, Cout)
    s, b = folded_bn(Cout); scales.append(s); biases.append(b)

    # dilated 3x3 branches
    w3_taps = []
    for _ in rates:
        w = conv_w(Cout, Cin, 3, 3)                                  # (Cout, Cin, 3, 3)
        w = jnp.transpose(w, (2, 3, 1, 0)).reshape(9, Cin, Cout)     # [ky*3+kx] x (Cin, Cout)
        w3_taps.append(w)
        s, b = folded_bn(Cout); scales.append(s); biases.append(b)
    w3 = jnp.concatenate(w3_taps, axis=0)                            # (9*nr, Cin, Cout)

    # 1x1 branch
    w1 = conv_w(Cout, Cin, 1, 1)[:, :, 0, 0].T
    s, b = folded_bn(Cout); scales.append(s); biases.append(b)

    # final conv1_1 ((nr+2)*Cout -> Cout) + BN
    wproj = conv_w(Cout, (nr + 2) * Cout, 1, 1)[:, :, 0, 0].T        # ((nr+2)*Cout, Cout)
    ps, pb = folded_bn(Cout)

    return dict(
        wpool=wpool, w3=w3, w1=w1, wproj=wproj,
        scales=jnp.stack(scales), biases=jnp.stack(biases),
        pscale=ps[None, :], pbias=pb[None, :],
    )


if __name__ == "__main__":
    key = jax.random.PRNGKey(0)
    k_x, k_p = jax.random.split(key)

    # Small synthetic shapes; H=20, W=13 deliberately exercise the cdiv-tiled grid
    # (ragged last H-tile) and the W -> W_pad aligned-store path.
    N, Cin, H, W = 2, 4, 20, 13
    Cout = 8
    rates = (6, 12, 18)

    x = jax.random.normal(k_x, (N, Cin, H, W), jnp.float32)          # NCHW, like PyTorch
    params = make_params(k_p, Cin, Cout, rates)

    # tile_h=8 -> 3 H-tiles per image: exercises the double-buffered halo-slab DMA.
    out = aspp_pallas(x, params, rates, tile_h=8)
    out = jax.block_until_ready(out)

    assert out.shape == (N, Cout, H, W), out.shape
    assert bool(jnp.all(jnp.isfinite(out)))
    print("KERNEL_OK")
</pallas_src>

<mosaic_0001>
module attributes {stable_mosaic.version = 11 : i64} {
  func.func @_gap_kernel(%arg0: i32, %arg1: i32, %arg2: memref<1x8x56x128xbf16, #tpu.memory_space<vmem>>, %arg3: memref<1x1x128xf32, #tpu.memory_space<vmem>>) attributes {dimension_semantics = [#tpu.dimension_semantics<parallel>, #tpu.dimension_semantics<arbitrary>], iteration_bounds = array<i64: 2, 8>, scalar_prefetch = 0 : i64, scratch_operands = 0 : i64, tpu.core_type = #tpu.core_type<tc>, window_params = [{transform_indices = @transform_0, window_bounds = array<i64: 1, 8, 56, 128>}, {transform_indices = @transform_1, window_bounds = array<i64: 1, 1, 128>}]} {
    %c0_i32 = arith.constant 0 : i32
    %0 = arith.cmpi eq, %arg1, %c0_i32 : i32
    %1 = arith.extui %0 : i1 to i32
    %c0_i32_0 = arith.constant 0 : i32
    %2 = arith.cmpi ne, %1, %c0_i32_0 : i32
    scf.if %2 {
      %cst_11 = arith.constant 0.000000e+00 : f32
      %13 = vector.broadcast %cst_11 : f32 to vector<1x1x128xf32>
      %c0_12 = arith.constant 0 : index
      %c0_13 = arith.constant 0 : index
      %c0_14 = arith.constant 0 : index
      %14 = vector.load %arg3[%c0_12, %c0_13, %c0_14] : memref<1x1x128xf32, #tpu.memory_space<vmem>>, vector<1x1x128xf32>
      tpu.vector_store %arg3[%c0_12, %c0_13, %c0_14], %13 {strides = array<i32>} : memref<1x1x128xf32, #tpu.memory_space<vmem>>, vector<1x1x128xf32>,
    } else {
    }
    %c0 = arith.constant 0 : index
    %c0_1 = arith.constant 0 : index
    %c0_2 = arith.constant 0 : index
    %c0_3 = arith.constant 0 : index
    %3 = vector.load %arg2[%c0, %c0_1, %c0_2, %c0_3] : memref<1x8x56x128xbf16, #tpu.memory_space<vmem>>, vector<1x8x56x128xbf16>
    %4 = arith.extf %3 : vector<1x8x56x128xbf16> to vector<1x8x56x128xf32>
    %cst = arith.constant dense<0.000000e+00> : vector<1x128xf32>
    %5 = vector.multi_reduction <add>, %4, %cst [1, 2] : vector<1x8x56x128xf32> to vector<1x128xf32>
    %6 = vector.shape_cast %5 : vector<1x128xf32> to vector<1x1x1x128xf32>
    %c0_4 = arith.constant 0 : index
    %c0_5 = arith.constant 0 : index
    %c0_6 = arith.constant 0 : index
    %7 = vector.load %arg3[%c0_4, %c0_5, %c0_6] : memref<1x1x128xf32, #tpu.memory_space<vmem>>, vector<1x1x128xf32>
    %8 = vector.shape_cast %6 : vector<1x1x1x128xf32> to vector<1x1x128xf32>
    %cst_7 = arith.constant 0.00384615385 : f32
    %9 = vector.broadcast %cst_7 : f32 to vector<1x1x128xf32>
    %10 = arith.mulf %8, %9 : vector<1x1x128xf32>
    %11 = arith.addf %7, %10 : vector<1x1x128xf32>
    %c0_8 = arith.constant 0 : index
    %c0_9 = arith.constant 0 : index
    %c0_10 = arith.constant 0 : index
    %12 = vector.load %arg3[%c0_8, %c0_9, %c0_10] : memref<1x1x128xf32, #tpu.memory_space<vmem>>, vector<1x1x128xf32>
    tpu.vector_store %arg3[%c0_8, %c0_9, %c0_10], %11 {strides = array<i32>} : memref<1x1x128xf32, #tpu.memory_space<vmem>>, vector<1x1x128xf32>,
    return
  }
  func.func @transform_0(%arg0: i32, %arg1: i32) -> (i32, i32, i32, i32) {
    %c0_i32 = arith.constant 0 : i32
    %c0_i32_0 = arith.constant 0 : i32
    %c0_i32_1 = arith.constant 0 : i32
    return %arg0, %arg1, %c0_i32, %c0_i32_0 : i32, i32, i32, i32
  }
  func.func @transform_1(%arg0: i32, %arg1: i32) -> (i32, i32, i32) {
    %c0_i32 = arith.constant 0 : i32
    %c0_i32_0 = arith.constant 0 : i32
    %c0_i32_1 = arith.constant 0 : i32
    return %arg0, %c0_i32, %c0_i32_0 : i32, i32, i32
  }
}

</mosaic_0001>

<bundles_post_ra>
// kernel: tpu_custom_call.1
= control target key start
LH: loop header
LB: loop body
LE: loop exit
PB: predicated region body
PF: predicated region fallthrough
CT: control target
= control target key end

     0   :  { %6 = vsyncpa [#allocation3], 0  ;;  %s1069_s0 = inlined_call_operand.hbm [shape: bf16[2,64,56,128], index: 0, kind: input, shape index: {}]   ;;  %s1070_s1 = inlined_call_operand.hbm [shape: f32[2,1,128], index: 1, kind: output, shape index: {}]  }
   0x1   :  { %8 = vsyncpa [#allocation3 + $0x1], 0 }
   0x2   :  { %9 = vsyncpa [#allocation4], 0 }
   0x3   :  { %11 = vsyncpa [#allocation4 + $0x1], 0  ;;  %s852_s6 = smov 0   ;;  %s854_s7 = smov 0  }
   0x4   :  { %s856_s8 = smov 0   ;;  %s858_s9 = smov 0  }
   0x5   :  { %s860_s10 = smov 0   ;;  %s862_s11 = smov 0  }
   0x6   :  { %s864_s12 = smov 0   ;;  %s866_s13 = smov 0  }
   0x7   :  { %s868_s14 = smov 0   ;;  %s870_s15 = smov 0  }
   0x8   :  { %s872_s16 = smov 0  }
   0x9 LB: > { %1075 = sst [smem:[#allocation8_spill]] %s827_s14  ;;  %s427_s17 = sadd.s32 4294967295, %s835_s16   ;;  %s835_s16 = sphi %s872_s16, %s17_s16   ;;  %s831_s15 = sphi %s870_s15, %s1089_s15   ;;  %s827_s14 = sphi %s868_s14, %s1088_s14   ;;  %s823_s13 = sphi %s866_s13, %s1087_s13   ;;  %s819_s12 = sphi %s864_s12, %s1086_s12   ;;  %s815_s11 = sphi %s862_s11, %s1095_s11   ;;  %s811_s10 = sphi %s860_s10, %s1094_s10   ;;  %s807_s9 = sphi %s858_s9, %s1093_s9   ;;  %s803_s8 = sphi %s856_s8, %s1092_s8   ;;  %s799_s7 = sphi %s854_s7, %s1091_s7   ;;  %s795_s6 = sphi %s852_s6, %s1090_s6  }
   0xa   : > { %1076 = sst [smem:[#allocation9_spill]] %s831_s15  ;;  %s428_s18 = sadd.s32 4294967294, %s835_s16  }
   0xb   : > { %s26_s19 = sadd.s32 1, %s827_s14  ;;  %s29_s20 = sadd.s32 1, %s831_s15 }
   0xc   : > { %p27_p0 = scmp.ge.s32.totalorder %s26_s19, 8  ;;  %s38_s21 = sadd.s32 1, %s815_s11 }
   0xd   : > { %p45_p1 = scmp.ne.s32.totalorder %s815_s11, %s811_s10  ;;  %p46_p2 = scmp.eq.s32.totalorder %s835_s16, 0 }
   0xe   : > { %s1097_s19 = smov (%p27_p0, %s26_s19), 0  ;;  %s1099_s20 = smov (!%p27_p0, %s29_s20), %s831_s15 }
   0xf   : > { %1077 = sst [smem:[#allocation10_spill]] %s1097_s19  ;;  %s34_s22 = ssub.s32 %s827_s14, %s1097_s19 }
  0x10   : > { %p918_p3 = por %p46_p2, %p45_p1  ;;  %p31_p4 = scmp.ge.s32.totalorder %s1099_s20, 2 }
  0x11   : > { %p51_p5 = scmp.ne.s32.totalorder %s811_s10, %s807_s9  ;;  %p52_p6 = scmp.eq.s32.totalorder %s427_s17, 0 }
  0x12   : > { %s64_s24 = sadd.s32 1, %s803_s8  ;;  %s1101_s20 = smov (%p31_p4, %s1099_s20), 0 }
  0x13   : > { %1079 = sst [smem:[#allocation11_spill]] %s1101_s20  ;;  %p926_p7 = por %p52_p6, %p51_p5 }
  0x14   : > { %p74_p8 = scmp.ne.s32.totalorder %s803_s8, %s799_s7  ;;  %s33_s26 = ssub.s32 %s831_s15, %s1101_s20 }
  0x15   : > { %p75_p9 = scmp.eq.s32.totalorder %s427_s17, 15  ;;  %s35_s27 = sor.u32 %s34_s22, %s33_s26 }
  0x16   : > { %p62_p10 = scmp.eq.s32.totalorder %s33_s26, 0  ;;  %p36_p11 = scmp.eq.s32.totalorder %s35_s27, 0 }
  0x17   : > { %p934_p12 = por %p75_p9, %p74_p8  ;;  %p80_p13 = scmp.ne.s32.totalorder %s799_s7, %s795_s6 }
  0x18   : > { %s939_s29 = scalar_select %p62_p10, %s803_s8, %s64_s24  }
  0x19   : > { %s942_s30 = scalar_select %p36_p11, %s815_s11, %s38_s21  }
  0x1a   : > { %p81_p0 = scmp.eq.s32.totalorder %s428_s18, 15  ;;  %p594_p1 = scmp.lt.s32.totalorder %s835_s16, 16 }
  0x1b   : > { %1082 = sst [smem:[#allocation12_spill]] %s942_s30  ;;  %s101_s3 = sand.u32 1, %s815_s11  }
  0x1c   : > { %p947_p2 = por %p81_p0, %p80_p13  ;;  %s578_s4 = smul.u32 224, %s101_s3 }
  0x1d   : > { %s579_s5 = smul.u32 56, %s827_s14  ;;  %p955_p4 = pnand %p594_p1, %p918_p3 }
  0x1e   : > { %s580_s17 = smul.u32 448, %s831_s15  ;;  %s105_s22 = scalar_lea.vmem [#allocation2], %s578_s4 }
  0x1f   : > { %s115_s21 = sshll.u32 %s105_s22, 4  ;;  %s102_s19 = scalar_lea.sflag [#allocation3], %s101_s3  ;;  %s116_s21 = int_to_ptr.vmem [resolvable:$true] %s115_s21 }
  0x20   : > { %s112_s24 = sadd.s32 %s580_s17, %s579_s5  ;;  %p689_p5 = pneg %p955_p4 }
  0x21   : > { %s433_s18 = sshll.u32 %s112_s24, 6  ;;  %s700_s14 = scalar_lea.vmem %s116_s21, 3584 }
  0x22   : > { %s114_s20 = scalar_lea.hbm %s1069_s0, %s433_s18  ;;  %p701_p6 = scmp.ne.s32.totalorder %s116_s21, %s700_s14 }
  0x23   : > { %s837_s23 = smov [#allocation2]  }
  0x24   : > { %p703_p3 = pnand %p701_p6, %p689_p5  ;;  %s705_s30 = sshll.u32 %s837_s23, 4  ;;  %s706_s30 = int_to_ptr.vmem [resolvable:$false] %s705_s30 }
  0x25   : > { %s707_s15 = scalar_lea.vmem %s706_s30, 7168  ;;  %p708_p9 = scmp.lt.s32.totalorder %s116_s21, %s706_s30 }
  0x26   : > { %p704_p8 = pneg %p703_p3  ;;  %p709_p10 = scmp.lt.s32.totalorder %s707_s15, %s700_s14 }
  0x28   : > { %p710_p11 = por %p709_p10, %p708_p9 }
  0x2a   : > { %p711_p13 = pnand %p710_p11, %p704_p8 }
  0x2c   : > { %714 = shalt.err (!%p711_p13)
}
  0x2d   : > { %s838_s4 = smov 64   ;;  %s839_s3 = smov 4  }
  0x2e   : > { %589 = dma.hbm_to_vmem [thread:$0]  (!%p955_p4), %s114_s20, 3584, %s116_s21, %s102_s19, %s838_s4, %s838_s4, %s839_s3  }
  0x2f   : > { %p434_p0 = scmp.ge.s32.totalorder %s835_s16, 1  ;;  %p123_p1 = scmp.lt.s32.totalorder %s835_s16, 17 }
  0x31   : > { %p124_p5 = pnand %p434_p0, %p123_p1 }
  0x32   : > { %s129_s5 = sand.u32 (!%p124_p5), 1, %s811_s10  }
  0x33   : > { %127 = sbr.rel (%p124_p5) target bundleno = 208 (0xd0), region = 24  ;;  %s130_s30 = scalar_lea.sflag (!%p124_p5), [#allocation3], %s129_s5 }
  0x34   : > { %s581_s17 = smul.u32 (!%p124_p5), 224, %s129_s5 }
  0x36   : > { %s970_s14 = scalar_lea.vmem (!%p124_p5), [#allocation2], %s581_s17 }
  0x38   : > { %786 = dma.done.wait (%p926_p7), %s130_s30, 3584  }
  0x39   : > { %788 = vsyncadd (%p926_p7), %s130_s30, 4294963712  ;;  %s149_s15 = sand.u32 1, %s799_s7   ;;  %p435_p4 = scmp.ne.s32.totalorder %s819_s12, 0 }
  0x3a   : > { %s979_s19 = scalar_lea.vmem [#allocation5], %s149_s15 }
  0x3b   : > { %155 = sbr.rel (%p435_p4) target bundleno = 66 (0x42), region = 32 }
  0x40   : > { %v840_v0 = vmov 0.0  }
  0x41   : > { %156 = vst [vmem:[%s979_s19] sm:$0x1] %v840_v0 }
  0x42 PF: > { %v440_v1 = vld [vmem:[%s970_s14] sm:$0xff]   ;;  %v551_v2 = vld [vmem:[%s970_s14 + $0x8] sm:$0xff]   ;;  %v552_v6 = vld [vmem:[%s970_s14 + $0x10] sm:$0xff]   ;;  %s436_s12 = sshll.u32 %s823_s13, 4  ;;  %s347_s20 = sshll.u32 %s979_s19, 4  ;;  %s348_s20 = int_to_ptr.vmem [resolvable:$true] %s347_s20 }
  0x43   : > { %v441_v3 = vunpack.c.l.bf16 %v440_v1  ;;  %v442_v4 = vunpack.c.h.bf16 %v440_v1  ;;  %v445_v5 = vunpack.c.l.bf16 %v551_v2  ;;  %v446_v7 = vunpack.c.h.bf16 %v551_v2  ;;  %v553_v11 = vld [vmem:[%s970_s14 + $0x18] sm:$0xff]   ;;  %v554_v16 = vld [vmem:[%s970_s14 + $0x20] sm:$0xff]   ;;  %v555_v21 = vld [vmem:[%s970_s14 + $0x28] sm:$0xff]   ;;  %s345_s22 = scalar_lea.hbm %s1070_s1, %s436_s12  ;;  %s335_s21 = scalar_lea.sflag [#allocation4], %s149_s15 }
  0x44   : > { %v449_v9 = vunpack.c.l.bf16 %v552_v6  ;;  %v450_v12 = vunpack.c.h.bf16 %v552_v6  ;;  %v453_v14 = vunpack.c.l.bf16 %v553_v11  ;;  %v454_v17 = vunpack.c.h.bf16 %v553_v11  ;;  %v556_v26 = vld [vmem:[%s970_s14 + $0x30] sm:$0xff]   ;;  %v557_v31 = vld [vmem:[%s970_s14 + $0x38] sm:$0xff]   ;;  %v558_v36 = vld [vmem:[%s970_s14 + $0x40] sm:$0xff]   ;;  %s715_s24 = scalar_lea.vmem %s348_s20, 16  ;;  %s841_s18 = smov [#allocation5]  }
  0x45   : > { %v269_v8 = vadd.f32 %v442_v4, %v441_v3  ;;  %v457_v19 = vunpack.c.l.bf16 %v554_v16  ;;  %v458_v22 = vunpack.c.h.bf16 %v554_v16  ;;  %v461_v24 = vunpack.c.l.bf16 %v555_v21  ;;  %v559_v41 = vld [vmem:[%s970_s14 + $0x48] sm:$0xff]   ;;  %v560_v46 = vld [vmem:[%s970_s14 + $0x50] sm:$0xff]   ;;  %v561_v51 = vld [vmem:[%s970_s14 + $0x58] sm:$0xff]   ;;  %p716_p7 = scmp.ne.s32.totalorder %s348_s20, %s715_s24  ;;  %s719_s26 = sshll.u32 %s841_s18, 4  ;;  %s720_s26 = int_to_ptr.vmem [resolvable:$false] %s719_s26 }
  0x46   : > { %v462_v27 = vunpack.c.h.bf16 %v555_v21  ;;  %v465_v29 = vunpack.c.l.bf16 %v556_v26  ;;  %v466_v32 = vunpack.c.h.bf16 %v556_v26  ;;  %v469_v34 = vunpack.c.l.bf16 %v557_v31  ;;  %v562_v56 = vld [vmem:[%s970_s14 + $0x60] sm:$0xff]   ;;  %v563_v61 = vld [vmem:[%s970_s14 + $0x68] sm:$0xff]   ;;  %v564_v2 = vld [vmem:[%s970_s14 + $0x70] sm:$0xff]   ;;  %s721_s13 = scalar_lea.vmem %s720_s26, 32  ;;  %p722_p8 = scmp.lt.s32.totalorder %s348_s20, %s720_s26 }
  0x47   : > { %v270_v10 = vadd.f32 %v445_v5, %v269_v8  ;;  %v470_v37 = vunpack.c.h.bf16 %v557_v31  ;;  %v473_v39 = vunpack.c.l.bf16 %v558_v36  ;;  %v474_v42 = vunpack.c.h.bf16 %v558_v36  ;;  %p717_p6 = pnand %p716_p7, %p934_p12  ;;  %p723_p9 = scmp.lt.s32.totalorder %s721_s13, %s715_s24 }
  0x48   : > { %v477_v44 = vunpack.c.l.bf16 %v559_v41  ;;  %v478_v47 = vunpack.c.h.bf16 %v559_v41  ;;  %v481_v49 = vunpack.c.l.bf16 %v560_v46  ;;  %v482_v52 = vunpack.c.h.bf16 %v560_v46 }
  0x49   : > { %v271_v13 = vadd.f32 %v446_v7, %v270_v10  ;;  %v485_v54 = vunpack.c.l.bf16 %v561_v51  ;;  %v486_v57 = vunpack.c.h.bf16 %v561_v51  ;;  %v489_v59 = vunpack.c.l.bf16 %v562_v56  ;;  %v565_v7 = vld [vmem:[%s970_s14 + $0x78] sm:$0xff]   ;;  %p718_p3 = pneg %p717_p6  ;;  %p724_p10 = por %p723_p9, %p722_p8 }
  0x4a   : > { %v490_v62 = vunpack.c.h.bf16 %v562_v56  ;;  %v493_v0 = vunpack.c.l.bf16 %v563_v61  ;;  %v494_v3 = vunpack.c.h.bf16 %v563_v61  ;;  %v497_v5 = vunpack.c.l.bf16 %v564_v2 }
  0x4b   : > { %v272_v15 = vadd.f32 %v449_v9, %v271_v13  ;;  %v498_v8 = vunpack.c.h.bf16 %v564_v2  ;;  %v501_v10 = vunpack.c.l.bf16 %v565_v7  ;;  %v502_v13 = vunpack.c.h.bf16 %v565_v7  ;;  %p725_p11 = pnand %p724_p10, %p718_p3 }
  0x4d   : > { %v273_v18 = vadd.f32 %v450_v12, %v272_v15  ;;  %v566_v12 = vld [vmem:[%s970_s14 + $0x80] sm:$0xff]  }
  0x4e   : > { %v505_v15 = vunpack.c.l.bf16 %v566_v12 }
  0x4f   : > { %v274_v20 = vadd.f32 %v453_v14, %v273_v18  ;;  %v506_v18 = vunpack.c.h.bf16 %v566_v12 }
  0x51   : > { %v275_v23 = vadd.f32 %v454_v17, %v274_v20  ;;  %v567_v17 = vld [vmem:[%s970_s14 + $0x88] sm:$0xff]  }
  0x52   : > { %v509_v20 = vunpack.c.l.bf16 %v567_v17 }
  0x53   : > { %v276_v25 = vadd.f32 %v457_v19, %v275_v23  ;;  %v510_v23 = vunpack.c.h.bf16 %v567_v17 }
  0x55   : > { %v277_v28 = vadd.f32 %v458_v22, %v276_v25  ;;  %v568_v22 = vld [vmem:[%s970_s14 + $0x90] sm:$0xff]  }
  0x56   : > { %v513_v25 = vunpack.c.l.bf16 %v568_v22 }
  0x57   : > { %v278_v30 = vadd.f32 %v461_v24, %v277_v28  ;;  %v514_v28 = vunpack.c.h.bf16 %v568_v22 }
  0x59   : > { %v279_v33 = vadd.f32 %v462_v27, %v278_v30  ;;  %v569_v27 = vld [vmem:[%s970_s14 + $0x98] sm:$0xff]  }
  0x5a   : > { %v517_v30 = vunpack.c.l.bf16 %v569_v27 }
  0x5b   : > { %v280_v35 = vadd.f32 %v465_v29, %v279_v33  ;;  %v518_v33 = vunpack.c.h.bf16 %v569_v27 }
  0x5d   : > { %v281_v38 = vadd.f32 %v466_v32, %v280_v35  ;;  %v570_v32 = vld [vmem:[%s970_s14 + $0xa0] sm:$0xff]  }
  0x5e   : > { %v521_v35 = vunpack.c.l.bf16 %v570_v32 }
  0x5f   : > { %v282_v40 = vadd.f32 %v469_v34, %v281_v38  ;;  %v522_v38 = vunpack.c.h.bf16 %v570_v32 }
  0x61   : > { %v283_v43 = vadd.f32 %v470_v37, %v282_v40  ;;  %v571_v37 = vld [vmem:[%s970_s14 + $0xa8] sm:$0xff]  }
  0x62   : > { %v525_v40 = vunpack.c.l.bf16 %v571_v37 }
  0x63   : > { %v284_v45 = vadd.f32 %v473_v39, %v283_v43  ;;  %v526_v43 = vunpack.c.h.bf16 %v571_v37 }
  0x65   : > { %v285_v48 = vadd.f32 %v474_v42, %v284_v45  ;;  %v572_v42 = vld [vmem:[%s970_s14 + $0xb0] sm:$0xff]  }
  0x66   : > { %v529_v45 = vunpack.c.l.bf16 %v572_v42 }
  0x67   : > { %v286_v50 = vadd.f32 %v477_v44, %v285_v48  ;;  %v530_v48 = vunpack.c.h.bf16 %v572_v42 }
  0x69   : > { %v287_v53 = vadd.f32 %v478_v47, %v286_v50  ;;  %v573_v47 = vld [vmem:[%s970_s14 + $0xb8] sm:$0xff]  }
  0x6a   : > { %v533_v50 = vunpack.c.l.bf16 %v573_v47 }
  0x6b   : > { %v288_v55 = vadd.f32 %v481_v49, %v287_v53  ;;  %v534_v53 = vunpack.c.h.bf16 %v573_v47 }
  0x6d   : > { %v289_v58 = vadd.f32 %v482_v52, %v288_v55  ;;  %v574_v52 = vld [vmem:[%s970_s14 + $0xc0] sm:$0xff]  }
  0x6e   : > { %v537_v55 = vunpack.c.l.bf16 %v574_v52 }
  0x6f   : > { %v290_v60 = vadd.f32 %v485_v54, %v289_v58  ;;  %v538_v58 = vunpack.c.h.bf16 %v574_v52 }
  0x71   : > { %v291_v63 = vadd.f32 %v486_v57, %v290_v60  ;;  %v575_v57 = vld [vmem:[%s970_s14 + $0xc8] sm:$0xff]  }
  0x72   : > { %v541_v60 = vunpack.c.l.bf16 %v575_v57 }
  0x73   : > { %v292_v1 = vadd.f32 %v489_v59, %v291_v63  ;;  %v542_v63 = vunpack.c.h.bf16 %v575_v57 }
  0x75   : > { %v293_v4 = vadd.f32 %v490_v62, %v292_v1  ;;  %v576_v62 = vld [vmem:[%s970_s14 + $0xd0] sm:$0xff]  }
  0x76   : > { %v545_v1 = vunpack.c.l.bf16 %v576_v62 }
  0x77   : > { %v294_v6 = vadd.f32 %v493_v0, %v293_v4  ;;  %v546_v4 = vunpack.c.h.bf16 %v576_v62 }
  0x79   : > { %v295_v9 = vadd.f32 %v494_v3, %v294_v6  ;;  %v577_v3 = vld [vmem:[%s970_s14 + $0xd8] sm:$0xff]  }
  0x7a   : > { %v549_v6 = vunpack.c.l.bf16 %v577_v3 }
  0x7b   : > { %v296_v11 = vadd.f32 %v497_v5, %v295_v9 }
  0x7d   : > { %v297_v14 = vadd.f32 %v498_v8, %v296_v11  ;;  %v550_v8 = vunpack.c.h.bf16 %v577_v3 }
  0x7f   : > { %v298_v16 = vadd.f32 %v501_v10, %v297_v14 }
  0x81   : > { %v299_v19 = vadd.f32 %v502_v13, %v298_v16 }
  0x83   : > { %v300_v21 = vadd.f32 %v505_v15, %v299_v19 }
  0x85   : > { %v301_v24 = vadd.f32 %v506_v18, %v300_v21  ;;  %v330_v18 = vld [vmem:[%s979_s19] sm:$0x1] }
  0x87   : > { %v302_v26 = vadd.f32 %v509_v20, %v301_v24 }
  0x89   : > { %v303_v29 = vadd.f32 %v510_v23, %v302_v26 }
  0x8b   : > { %v304_v31 = vadd.f32 %v513_v25, %v303_v29 }
  0x8d   : > { %v305_v34 = vadd.f32 %v514_v28, %v304_v31 }
  0x8f   : > { %v306_v36 = vadd.f32 %v517_v30, %v305_v34 }
  0x91   : > { %v307_v39 = vadd.f32 %v518_v33, %v306_v36 }
  0x93   : > { %v308_v41 = vadd.f32 %v521_v35, %v307_v39 }
  0x95   : > { %v309_v44 = vadd.f32 %v522_v38, %v308_v41 }
  0x97   : > { %v310_v46 = vadd.f32 %v525_v40, %v309_v44 }
  0x99   : > { %v311_v49 = vadd.f32 %v526_v43, %v310_v46 }
  0x9b   : > { %v312_v51 = vadd.f32 %v529_v45, %v311_v49 }
  0x9d   : > { %v313_v54 = vadd.f32 %v530_v48, %v312_v51 }
  0x9f   : > { %v314_v56 = vadd.f32 %v533_v50, %v313_v54 }
  0xa1   : > { %v315_v59 = vadd.f32 %v534_v53, %v314_v56 }
  0xa3   : > { %v316_v61 = vadd.f32 %v537_v55, %v315_v59 }
  0xa5   : > { %v317_v0 = vadd.f32 %v538_v58, %v316_v61 }
  0xa7   : > { %v318_v2 = vadd.f32 %v541_v60, %v317_v0 }
  0xa9   : > { %v319_v5 = vadd.f32 %v542_v63, %v318_v2 }
  0xab   : > { %v320_v7 = vadd.f32 %v545_v1, %v319_v5 }
  0xad   : > { %v321_v9 = vadd.f32 %v546_v4, %v320_v7 }
  0xaf   : > { %v322_v10 = vadd.f32 %v549_v6, %v321_v9 }
  0xb1   : > { %v323_v11 = vadd.f32 %v550_v8, %v322_v10 }
  0xb3   : > { %v324_v12 = vrot.slane %v323_v11, 4 }
  0xb5   : > { %v325_v13 = vadd.f32 %v324_v12, %v323_v11 }
  0xb7   : > { %v326_v14 = vrot.slane %v325_v13, 2 }
  0xb9   : > { %v327_v15 = vadd.f32 %v326_v14, %v325_v13 }
  0xbb   : > { %v328_v16 = vrot.slane %v327_v15, 1 }
  0xbd   : > { %v329_v17 = vadd.f32 %v328_v16, %v327_v15 }
  0xbf   : > { %v331_v19 = vmul.f32 0.0038461538, %v329_v17 }
  0xc1   : > { %v332_v20 = vadd.f32 %v331_v19, %v330_v18 }
  0xc3   : > { %333 = vst [vmem:[%s979_s19] sm:$0x1] %v332_v20 }
  0xc4   : > { %728 = shalt.err (!%p725_p11)
}
  0xc5   : > { %s729_s27 = scalar_lea.hbm %s345_s22, 16  ;;  %s733_s3 = scalar_lea.hbm %s1070_s1, 32 }
  0xc6   : > { %p730_p13 = scmp.ne.s32.totalorder %s345_s22, %s729_s27  ;;  %p734_p5 = scmp.lt.s32.totalorder %s345_s22, %s1070_s1 }
  0xc7   : > { %p735_p4 = scmp.lt.s32.totalorder %s733_s3, %s729_s27 }
  0xc8   : > { %p731_p0 = pnand %p730_p13, %p934_p12 }
  0xc9   : > { %p736_p7 = por %p735_p4, %p734_p5 }
  0xca   : > { %p732_p1 = pneg %p731_p0 }
  0xcc   : > { %p737_p6 = pnand %p736_p7, %p732_p1 }
  0xce   : > { %740 = shalt.err (!%p737_p6)
}
  0xcf   : > { %584 = dma.vmem_to_hbm [thread:$0]  (%p934_p12), %s348_s20, 16, %s345_s22, %s335_s21  }
  0xd0 PF: > { %p595_p3 = scmp.ge.s32.totalorder %s835_s16, 2  ;;  %s359_s30 = sand.u32 1, %s795_s6  }
  0xd1   : > { %s360_s14 = scalar_lea.sflag [#allocation4], %s359_s30 }
  0xd2   : > { %p591_p8 = pnand %p595_p3, %p947_p2 }
  0xd4   : > { %p592_p9 = pneg %p591_p8 }
  0xd6   : > { %790 = dma.done.wait (%p592_p9), %s360_s14, 16  }
  0xd7   : > { %792 = vsyncadd (%p592_p9), %s360_s14, 4294967280  ;;  %s17_s16 = sadd.s32 1, %s835_s16   ;;  %s1085_s28 = sld [smem:[#allocation12_spill]] }
  0xd8   : > { %p14_p10 = scmp.ge.s32.totalorder %s17_s16, 18   ;;  %s1086_s12 = sld [smem:[#allocation8_spill]] }
  0xd9   : > { %s1087_s13 = sld [smem:[#allocation9_spill]]  ;;  %s1090_s6 = smov %s799_s7 }
  0xda   : > { %s1088_s14 = sld [smem:[#allocation10_spill]]  ;;  %s1091_s7 = smov %s803_s8 }
  0xdb   : > { %s1089_s15 = sld [smem:[#allocation11_spill]]  ;;  %s1092_s8 = smov %s939_s29 }
  0xdc   : > { %s1093_s9 = smov %s811_s10  ;;  %s1094_s10 = smov %s815_s11 }
  0xdd   : > { %s1095_s11 = smov %s1085_s28  ;;  %16 = sbr.rel (!%p14_p10) target bundleno = 9 (0x9), region = 73 }
  0xe2   :  { %364 = vsyncpa [#allocation3], 1 }
  0xe3   :  { %366 = vsyncpa [#allocation3 + $0x1], 1 }
  0xe4   :  { %367 = vsyncpa [#allocation4], 1 }
  0xe5   :  { %369 = vsyncpa [#allocation4 + $0x1], 1 }

</bundles_post_ra>
